<compile_context>
chip_gen: v6e
topology: v6e:2x2x1
jax: 0.10.0
libtpu: 0.0.40
codegen_flags: <defaults>
</compile_context>

<pallas_src>
import jax
import jax.numpy as jnp
from jax.experimental import pallas as pl
from jax.experimental.pallas import tpu as pltpu


# ------------------------------------------------------------------ helpers
def _round_up(x, m):
    return ((x + m - 1) // m) * m


def _cdiv(a, b):
    return (a + b - 1) // b


def _vmem_capacity_bytes():
    try:
        return int(pltpu.get_tpu_info().vmem_capacity_bytes)
    except Exception:
        return 64 * 1024 * 1024  # conservative default (v7x per-TensorCore)


def _vmem_limit(needed_bytes, vmem_capacity):
    # Raise the scoped VMEM limit enough for our tiles + Mosaic scratch,
    # but never claim (almost) all of physical VMEM.
    limit = max(needed_bytes + (16 << 20), 32 << 20)
    return int(min(limit, int(vmem_capacity * 0.9)))


def _pick_tile(dim, cap, base):
    """Largest tile (multiple of `base`, <= cap) minimizing padding of `dim`."""
    dim_r = _round_up(max(dim, 1), base)
    if dim_r <= cap:
        return dim_r
    best_t, best_pad = base, _round_up(dim, base)
    t = base
    while t <= cap:
        p = _round_up(dim, t)
        if p <= best_pad:          # ties -> prefer the larger tile
            best_t, best_pad = t, p
        t += base
    return best_t


# ------------------------------------------------------------------ kernels
def _linear_wres_kernel(x_ref, w_ref, b_ref, o_ref):
    # Weight-resident path: W block index is constant across the (parallel) M
    # grid axis, so W is DMA'd into VMEM once and reused by every step.
    # x: (tm, k_pad)  w: (k_pad, n_pad)  b: (1, n_pad) f32  o: (tm, n_pad) f32
    o_ref[...] = (
        jnp.dot(x_ref[...], w_ref[...], preferred_element_type=jnp.float32)
        + b_ref[...]
    )


def _linear_stream_kernel(x_ref, w_ref, b_ref, o_ref):
    # Streaming path: output block index ignores k -> the f32 output block is
    # resident across the K (reduction, "arbitrary") axis, so accumulate
    # directly into it (no separate scratch).  Bias is folded into the init.
    # x: (tm, tk)  w: (tk, tn)  b: (1, tn) f32  o: (tm, tn) f32
    k = pl.program_id(2)

    @pl.when(k == 0)
    def _init():
        o_ref[...] = jnp.broadcast_to(b_ref[...], o_ref.shape)

    o_ref[...] += jnp.dot(
        x_ref[...], w_ref[...], preferred_element_type=jnp.float32
    )


# ------------------------------------------------------------------ wrapper
def make_linear(weight, bias, *, compute_dtype=None):
    """Build forward(x) computing x @ weight.T + bias (PyTorch nn.Linear).

    weight: (out_features, in_features)  -- PyTorch layout
    bias:   (out_features,)
    compute_dtype: optional narrower MXU operand dtype (e.g. jnp.bfloat16);
        accumulation stays float32 and the result is cast back to x.dtype.
    """
    out_features, in_features = weight.shape
    assert bias.shape == (out_features,)

    op_dtype = jnp.dtype(compute_dtype) if compute_dtype is not None \
        else jnp.dtype(weight.dtype)
    elt = op_dtype.itemsize
    sublane = 16 if elt < 4 else 8          # bf16 packs 2 rows / sublane

    vmem = _vmem_capacity_bytes()
    big_vmem = vmem >= 100 * 1024 * 1024    # v5e/v6e: 128 MiB; v7x: 64 MiB
    tm_cap, tn_cap = 512, 512
    tk_cap = 2048 if big_vmem else 1024

    # N / K tiling depends only on the weight shape — decide once here.
    tn = _pick_tile(out_features, tn_cap, 128)
    tk = _pick_tile(in_features, tk_cap, 128)
    n_pad = _round_up(out_features, tn)
    k_pad = _round_up(in_features, tk)

    # One-time packing (hoisted out of the per-call path): PyTorch (out, in)
    # -> (in, out) so the kernel is a plain NN-layout dot, cast, zero-pad.
    w_t = jnp.asarray(weight).T.astype(op_dtype)
    if (k_pad, n_pad) != (in_features, out_features):
        w_t = jnp.pad(w_t, ((0, k_pad - in_features), (0, n_pad - out_features)))
    b_row = jnp.asarray(bias).astype(jnp.float32).reshape(1, out_features)
    if n_pad != out_features:
        b_row = jnp.pad(b_row, ((0, 0), (0, n_pad - out_features)))
    w_t = jax.device_put(w_t)
    b_row = jax.device_put(b_row)

    wres_budget = vmem // 3                 # leave headroom for Mosaic scratch

    def _impl(x, w_p, b_p):
        lead_shape = x.shape[:-1]
        assert x.shape[-1] == in_features
        m = 1
        for d in lead_shape:
            m *= d
        x2d = x.reshape(m, in_features).astype(op_dtype)

        tm = _pick_tile(m, tm_cap, sublane)
        # Give the parallel M axis >= 2 iterations when possible so v7x's
        # second TensorCore gets work (harmless on 1-TC chips).
        if _cdiv(_round_up(m, sublane), tm) < 2 and tm > sublane:
            tm = _round_up(_cdiv(tm, 2), sublane)

        # ---- weight-resident plan: whole W stays in VMEM, W read once ----
        def _wres_bytes(tm_):
            return (2 * k_pad * n_pad * elt      # W (pipeline buffers)
                    + 2 * tm_ * k_pad * elt      # x tiles
                    + 2 * tm_ * n_pad * 4        # f32 output tiles
                    + 2 * n_pad * 4)             # bias

        tm_w = tm
        while tm_w > sublane and _wres_bytes(tm_w) > wres_budget:
            tm_w = _round_up(_cdiv(tm_w, 2), sublane)
        use_wres = _wres_bytes(tm_w) <= wres_budget

        if use_wres:
            tm_ = tm_w
            m_pad = _round_up(m, tm_)
            x_p = x2d
            if (m_pad, k_pad) != x2d.shape:
                x_p = jnp.pad(x2d, ((0, m_pad - m), (0, k_pad - in_features)))
            needed = _wres_bytes(tm_)
            cost = pl.CostEstimate(
                flops=2 * m_pad * n_pad * k_pad,
                transcendentals=0,
                bytes_accessed=(m_pad * k_pad * elt + k_pad * n_pad * elt
                                + n_pad * 4 + m_pad * n_pad * 4),
            )
            out_p = pl.pallas_call(
                _linear_wres_kernel,
                out_shape=jax.ShapeDtypeStruct((m_pad, n_pad), jnp.float32),
                grid_spec=pltpu.PrefetchScalarGridSpec(
                    num_scalar_prefetch=0,
                    grid=(m_pad // tm_,),
                    in_specs=[
                        pl.BlockSpec((tm_, k_pad), lambda i: (i, 0)),      # x
                        pl.BlockSpec((k_pad, n_pad), lambda i: (0, 0)),    # W (resident)
                        pl.BlockSpec((1, n_pad), lambda i: (0, 0)),        # bias
                    ],
                    out_specs=pl.BlockSpec((tm_, n_pad), lambda i: (i, 0)),
                ),
                compiler_params=pltpu.CompilerParams(
                    dimension_semantics=("parallel",),
                    vmem_limit_bytes=_vmem_limit(needed, vmem),
                ),
                cost_estimate=cost,
            )(x_p, w_p, b_p)
        else:
            # ---- streaming (M, N, K) grid with large tiles ----
            m_pad = _round_up(m, tm)
            x_p = x2d
            if (m_pad, k_pad) != x2d.shape:
                x_p = jnp.pad(x2d, ((0, m_pad - m), (0, k_pad - in_features)))
            grid = (m_pad // tm, n_pad // tn, k_pad // tk)
            needed = (2 * tm * tk * elt + 2 * tk * tn * elt
                      + 2 * tm * tn * 4 + 2 * tn * 4)
            cost = pl.CostEstimate(
                flops=2 * m_pad * n_pad * k_pad,
                transcendentals=0,
                bytes_accessed=(m_pad * k_pad * elt * grid[1]   # x re-read per N tile
                                + k_pad * n_pad * elt * grid[0]  # W re-read per M tile
                                + n_pad * 4 + m_pad * n_pad * 4),
            )
            out_p = pl.pallas_call(
                _linear_stream_kernel,
                out_shape=jax.ShapeDtypeStruct((m_pad, n_pad), jnp.float32),
                grid_spec=pltpu.PrefetchScalarGridSpec(
                    num_scalar_prefetch=0,
                    grid=grid,
                    in_specs=[
                        pl.BlockSpec((tm, tk), lambda i, j, k: (i, k)),   # x
                        pl.BlockSpec((tk, tn), lambda i, j, k: (k, j)),   # W (in, out)
                        pl.BlockSpec((1, tn), lambda i, j, k: (0, j)),    # bias
                    ],
                    out_specs=pl.BlockSpec((tm, tn), lambda i, j, k: (i, j)),
                ),
                compiler_params=pltpu.CompilerParams(
                    dimension_semantics=("parallel", "parallel", "arbitrary"),
                    vmem_limit_bytes=_vmem_limit(needed, vmem),
                ),
                cost_estimate=cost,
            )(x_p, w_p, b_p)

        out2d = out_p[:m, :out_features].astype(x.dtype)
        return out2d.reshape(*lead_shape, out_features)

    forward = jax.jit(_impl)
    return lambda x: forward(x, w_t, b_row)


def init_linear_params(key, in_features, out_features, dtype=jnp.float32):
    # kaiming_normal_ (fan_in, leaky_relu a=0): std = sqrt(2 / fan_in)
    std = (2.0 / in_features) ** 0.5
    weight = std * jax.random.normal(key, (out_features, in_features), dtype=dtype)
    bias = jnp.zeros((out_features,), dtype=dtype)  # nn.init.constant_(bias, 0)
    return weight, bias


if __name__ == "__main__":
    key = jax.random.PRNGKey(0)
    k_w, k_x = jax.random.split(key)

    batch, seq, in_features, out_features = 2, 8, 32, 64

    weight, bias = init_linear_params(k_w, in_features, out_features)
    x = jax.random.normal(k_x, (batch, seq, in_features), dtype=jnp.float32)

    # Default keeps exact nn.Linear f32 semantics.
    # TODO(synk): pass compute_dtype=jnp.bfloat16 for ~2x MXU / HBM when
    # accuracy budget allows.
    linear = make_linear(weight, bias)
    y = jax.block_until_ready(linear(x))

    # sanity check vs plain-JAX reference
    y_ref = x @ weight.T + bias
    assert y.shape == (batch, seq, out_features)
    assert jnp.allclose(y, y_ref, atol=1e-5, rtol=1e-5)

    print("KERNEL_OK")
</pallas_src>

<mosaic_0001>
module attributes {stable_mosaic.version = 11 : i64} {
  func.func @_linear_wres_kernel(%arg0: i32, %arg1: memref<8x128xf32, #tpu.memory_space<vmem>>, %arg2: memref<128x128xf32, #tpu.memory_space<vmem>>, %arg3: memref<1x128xf32, #tpu.memory_space<vmem>>, %arg4: memref<8x128xf32, #tpu.memory_space<vmem>>) attributes {dimension_semantics = [#tpu.dimension_semantics<parallel>], iteration_bounds = array<i64: 2>, scalar_prefetch = 0 : i64, scratch_operands = 0 : i64, tpu.core_type = #tpu.core_type<tc>, window_params = [{transform_indices = @transform_0, window_bounds = array<i64: 8, 128>}, {pipeline_mode = #tpu.pipeline_mode<synchronous>, transform_indices = @transform_1, window_bounds = array<i64: 128, 128>}, {pipeline_mode = #tpu.pipeline_mode<synchronous>, transform_indices = @transform_2, window_bounds = array<i64: 1, 128>}, {transform_indices = @transform_3, window_bounds = array<i64: 8, 128>}]} {
    %c0 = arith.constant 0 : index
    %c0_0 = arith.constant 0 : index
    %0 = vector.load %arg1[%c0, %c0_0] : memref<8x128xf32, #tpu.memory_space<vmem>>, vector<8x128xf32>
    %c0_1 = arith.constant 0 : index
    %c0_2 = arith.constant 0 : index
    %1 = vector.load %arg2[%c0_1, %c0_2] : memref<128x128xf32, #tpu.memory_space<vmem>>, vector<128x128xf32>
    %cst = arith.constant dense<0.000000e+00> : vector<8x128xf32>
    %2 = tpu.matmul %0, %1, %cst {dimension_numbers = #tpu.dot_dimension_numbers<[1], [0], [0], [1], [0, 0, 1, 1], [], []>} : vector<8x128xf32>, vector<128x128xf32>, vector<8x128xf32> -> vector<8x128xf32>
    %c0_3 = arith.constant 0 : index
    %c0_4 = arith.constant 0 : index
    %3 = vector.load %arg3[%c0_3, %c0_4] : memref<1x128xf32, #tpu.memory_space<vmem>>, vector<1x128xf32>
    %4 = vector.broadcast %3 : vector<1x128xf32> to vector<8x128xf32>
    %5 = arith.addf %2, %4 : vector<8x128xf32>
    %c0_5 = arith.constant 0 : index
    %c0_6 = arith.constant 0 : index
    %6 = vector.load %arg4[%c0_5, %c0_6] : memref<8x128xf32, #tpu.memory_space<vmem>>, vector<8x128xf32>
    tpu.vector_store %arg4[%c0_5, %c0_6], %5 {strides = array<i32>} : memref<8x128xf32, #tpu.memory_space<vmem>>, vector<8x128xf32>,
    return
  }
  func.func @transform_0(%arg0: i32) -> (i32, i32) {
    %c0_i32 = arith.constant 0 : i32
    %c0_i32_0 = arith.constant 0 : i32
    return %arg0, %c0_i32 : i32, i32
  }
  func.func @transform_1(%arg0: i32) -> (i32, i32) {
    %c0_i32 = arith.constant 0 : i32
    %c0_i32_0 = arith.constant 0 : i32
    %c0_i32_1 = arith.constant 0 : i32
    return %c0_i32, %c0_i32_0 : i32, i32
  }
  func.func @transform_2(%arg0: i32) -> (i32, i32) {
    %c0_i32 = arith.constant 0 : i32
    %c0_i32_0 = arith.constant 0 : i32
    %c0_i32_1 = arith.constant 0 : i32
    return %c0_i32, %c0_i32_0 : i32, i32
  }
  func.func @transform_3(%arg0: i32) -> (i32, i32) {
    %c0_i32 = arith.constant 0 : i32
    %c0_i32_0 = arith.constant 0 : i32
    return %arg0, %c0_i32 : i32, i32
  }
}

</mosaic_0001>

<bundles_post_ra>
// kernel: _impl.1
= control target key start
LH: loop header
LB: loop body
LE: loop exit
PB: predicated region body
PF: predicated region fallthrough
CT: control target
= control target key end

     0   :  { %8 = vsyncpa [#allocation3], 0  ;;  %s491_s12 = smov 0   ;;  %s533_s0 = inlined_call_operand.vmem [shape: f32[16,128], index: 0, kind: input, shape index: {}]   ;;  %s534_s1 = inlined_call_operand.hbm [shape: f32[128,128], index: 1, kind: input, shape index: {}]   ;;  %s535_s2 = inlined_call_operand.vmem [shape: f32[1,128], index: 2, kind: input, shape index: {}]   ;;  %s536_s3 = inlined_call_operand.vmem [shape: f32[16,128], index: 3, kind: output, shape index: {}]  }
   0x1 LB: > { %s497_s13 = sadd.s32 4294967295, %s464_s12   ;;  %p343_p0 = scmp.ge.s32.totalorder %s464_s12, 1  ;;  %s464_s12 = sphi %s491_s12, %s14_s12  }
   0x2   : > { %p113_p1 = scmp.lt.s32.totalorder %s464_s12, 3  ;;  %s466_s14 = smov [#allocation2]  }
   0x3   : > { %s125_s15 = sshll.u32 %s466_s14, 4  ;;  %p413_p3 = scmp.eq.s32.totalorder %s497_s13, 0  ;;  %s126_s15 = int_to_ptr.vmem [resolvable:$true] %s125_s15 }
   0x4   : > { %p501_p2 = pnand %p343_p0, %p113_p1  ;;  %s439_s17 = scalar_lea.vmem %s126_s15, 2048 }
   0x5   : > { %p440_p7 = scmp.ne.s32.totalorder %s126_s15, %s439_s17  ;;  %p447_p10 = scmp.lt.s32.totalorder %s126_s15, %s126_s15 }
   0x6   : > { %p409_p4 = pneg %p501_p2  ;;  %p448_p11 = scmp.lt.s32.totalorder %s439_s17, %s439_s17 }
   0x8   : > { %p410_p5 = pnand %p413_p3, %p409_p4  ;;  %p449_p12 = por %p448_p11, %p447_p10 }
   0xa   : > { %p430_p6 = pneg %p410_p5 }
   0xc   : > { %p442_p8 = pnand %p440_p7, %p430_p6 }
   0xe   : > { %p443_p9 = pneg %p442_p8 }
  0x10   : > { %p450_p13 = pnand %p449_p12, %p443_p9 }
  0x12   : > { %453 = shalt.err (!%p450_p13)
}
  0x13   : > { %s467_s18 = smov 128   ;;  %s468_s19 = smov 8  }
  0x14   : > { %412 = dma.hbm_to_vmem [thread:$0]  (!%p410_p5), %s534_s1, 2048, %s126_s15, [#allocation3], %s467_s18, %s467_s18, %s468_s19  }
  0x15   : > { %151 = sbr.rel (%p501_p2) target bundleno = 256 (0x100), region = 32 }
  0x1a   : > { %459 = dma.done.wait (%p413_p3), [#allocation3], 2048  }
  0x1b   : > { %461 = vsyncadd (%p413_p3), [#allocation3], 4294965248  ;;  %v469_v0 = vmov 0.0   ;;  %vm470_vm0 = vmmov 0   ;;  %v197_v1 = vld [vmem:[#allocation2 + $0x78] sm:$0xff]  ;;  %v196_v2 = vld [vmem:[#allocation2 + $0x70] sm:$0xff] }
  0x1c   : > { %370 = vmatprep.subr.mxu0 %v469_v0  ;;  %402 = vmatprep.mubr.msk.f32.mxu0 %vm470_vm0, %v469_v0  ;;  %v195_v3 = vld [vmem:[#allocation2 + $0x68] sm:$0xff]  ;;  %v194_v4 = vld [vmem:[#allocation2 + $0x60] sm:$0xff]  ;;  %v193_v5 = vld [vmem:[#allocation2 + $0x58] sm:$0xff]  ;;  %p173_p0 = scmp.lt.s32.totalorder %s497_s13, 1 }
  0x1d   : > { %371 = vmatpush3.msra.mxu0 %v197_v1  ;;  %v192_v6 = vld [vmem:[#allocation2 + $0x50] sm:$0xff]  ;;  %v191_v7 = vld [vmem:[#allocation2 + $0x48] sm:$0xff]  ;;  %v190_v8 = vld [vmem:[#allocation2 + $0x40] sm:$0xff] }
  0x1e   : > { %372 = vmatprep.subr.mxu0 %v469_v0  ;;  %v189_v9 = vld [vmem:[#allocation2 + $0x38] sm:$0xff]  ;;  %v188_v10 = vld [vmem:[#allocation2 + $0x30] sm:$0xff]  ;;  %v187_v11 = vld [vmem:[#allocation2 + $0x28] sm:$0xff]  ;;  %s539_s13 = smov (!%p173_p0, %s497_s13), 1 }
  0x1f   : > { %373 = vmatpush3.msra.mxu0 %v196_v2  ;;  %v186_v12 = vld [vmem:[#allocation2 + $0x20] sm:$0xff]  ;;  %v185_v13 = vld [vmem:[#allocation2 + $0x18] sm:$0xff]  ;;  %s348_s22 = sshll.u32 %s539_s13, 3  ;;  %v184_v14 = vld [vmem:[#allocation2 + $0x10] sm:$0xff] }
  0x20   : > { %374 = vmatprep.subr.mxu0 %v469_v0  ;;  %v183_v15 = vld [vmem:[#allocation2 + $0x8] sm:$0xff]  ;;  %s176_s25 = scalar_lea.vmem %s533_s0, %s348_s22  ;;  %v182_v16 = vld [vmem:[#allocation2] sm:$0xff]  ;;  %s180_s30 = scalar_lea.vmem %s536_s3, %s348_s22 }
  0x21   : > { %375 = vmatpush3.msra.mxu0 %v195_v3  ;;  %v181_v17 = vld [vmem:[%s176_s25] sm:$0xff] }
  0x22   : > { %376 = vmatprep.subr.mxu0 %v469_v0  ;;  %v350_v18 = vld [vmem:[%s535_s2] ss:$0 sm:$0xff] }
  0x23   : > { %377 = vmatpush3.msra.mxu0 %v194_v4 }
  0x24   : > { %378 = vmatprep.subr.mxu0 %v469_v0 }
  0x25   : > { %379 = vmatpush3.msra.mxu0 %v193_v5 }
  0x26   : > { %380 = vmatprep.subr.mxu0 %v469_v0 }
  0x27   : > { %381 = vmatpush3.msra.mxu0 %v192_v6 }
  0x28   : > { %382 = vmatprep.subr.mxu0 %v469_v0 }
  0x29   : > { %383 = vmatpush3.msra.mxu0 %v191_v7 }
  0x2a   : > { %384 = vmatprep.subr.mxu0 %v469_v0 }
  0x2b   : > { %385 = vmatpush3.msra.mxu0 %v190_v8 }
  0x2c   : > { %386 = vmatprep.subr.mxu0 %v469_v0 }
  0x2d   : > { %387 = vmatpush3.msra.mxu0 %v189_v9 }
  0x2e   : > { %388 = vmatprep.subr.mxu0 %v469_v0 }
  0x2f   : > { %389 = vmatpush3.msra.mxu0 %v188_v10 }
  0x30   : > { %390 = vmatprep.subr.mxu0 %v469_v0 }
  0x31   : > { %391 = vmatpush3.msra.mxu0 %v187_v11 }
  0x32   : > { %392 = vmatprep.subr.mxu0 %v469_v0 }
  0x33   : > { %393 = vmatpush3.msra.mxu0 %v186_v12 }
  0x34   : > { %394 = vmatprep.subr.mxu0 %v469_v0 }
  0x35   : > { %395 = vmatpush3.msra.mxu0 %v185_v13 }
  0x36   : > { %396 = vmatprep.subr.mxu0 %v469_v0 }
  0x37   : > { %397 = vmatpush3.msra.mxu0 %v184_v14 }
  0x38   : > { %398 = vmatprep.subr.mxu0 %v469_v0 }
  0x39   : > { %399 = vmatpush3.msra.mxu0 %v183_v15 }
  0x3a   : > { %400 = vmatprep.subr.mxu0 %v469_v0 }
  0x3b   : > { %401 = vmatpush3.msra.mxu0 %v182_v16 }
  0x3c   : > { %403 = vmatmul.mubr.f32.vlgmr.msra.gmra.mxu0 %v181_v17 }
  0xfc   : > { %v271_v19 = vpop.f32.mrf.mxu0 }
  0xfd   : > { %v272_v20 = vadd.f32 %v350_v18, %v271_v19 }
  0xfe   : > { %v404_v21 = vpop.f32.mrf.mxu0 }
  0xff   : > { %275 = vst [vmem:[%s180_s30] sm:$0xff] %v272_v20 }
 0x100 PF: > { %s14_s12 = sadd.s32 1, %s464_s12  }
 0x101   : > { %p11_p1 = scmp.ge.s32.totalorder %s14_s12, 4  }
 0x103   :  { %13 = sbr.rel (!%p11_p1) target bundleno = 1 (0x1), region = 67 }
 0x108   :  { %295 = vsyncpa [#allocation3], 1 }
 0x109   :  { %297 = vsyncpa [#allocation3 + $0x1], 1 }

</bundles_post_ra>
